<compile_context>
chip_gen: v7x
topology: tpu7x:2x2x1
jax: 0.10.0
libtpu: 0.0.40
codegen_flags: <defaults>
</compile_context>

<pallas_src>
import functools

import jax
import jax.numpy as jnp
from jax import lax
from jax.experimental import pallas as pl
from jax.experimental.pallas import tpu as pltpu

LANE = 128          # TPU lane width
NEG = -1e30         # mask value for padded classes (avoid -inf to dodge inf-inf NaNs)


def _round_up(v, m):
    return ((v + m - 1) // m) * m


def mlp_ce_kernel(labels_ref, x_ref, w1_ref, b1_ref, w2t_ref, b2_ref,
                  loss_ref, pred_ref, *, num_classes):
    """One batch tile: MLP forward + per-sample cross-entropy + argmax.

    labels_ref : (1, TB)  int32  VMEM (batch on lanes)
    x_ref      : (TB, D)  bf16   VMEM (pipelined stream)
    w1_ref     : (D, Hp)  bf16   VMEM (resident across grid steps)
    b1_ref     : (1, Hp)  f32    VMEM (resident)
    w2t_ref    : (Cs, Hp) bf16   VMEM (resident; torch (out, in) layout, Cs = 8)
    b2_ref     : (Cs, 1)  f32    VMEM (resident)
    loss_ref   : (1, TB)  f32    VMEM (lane-dense row -> unmasked full-lane stores)
    pred_ref   : (1, TB)  int32  VMEM (lane-dense row)
    """
    # ---- Layer 1: (TB, D) @ (D, Hp) bf16 on the MXU, bias + ReLU in f32 ----
    h = jnp.dot(x_ref[...], w1_ref[...], preferred_element_type=jnp.float32)
    h = jnp.maximum(h + b1_ref[...], 0.0).astype(jnp.bfloat16)          # (TB, Hp)

    # ---- Layer 2, transposed: st[c, b] = sum_k W2t[c, k] * h[b, k] ----
    # Contracting the last dim of both operands puts classes on sublanes and
    # batch on lanes, so every per-sample result below is already lane-dense.
    st = lax.dot_general(w2t_ref[...], h,
                         dimension_numbers=(((1,), (1,)), ((), ())),
                         preferred_element_type=jnp.float32)             # (Cs, TB)
    st = st + b2_ref[...]

    cs, _ = st.shape
    cls = lax.broadcasted_iota(jnp.int32, st.shape, 0)                   # class index
    # Mask padded classes so they cannot affect logsumexp / argmax.
    st = jnp.where(cls < num_classes, st, NEG)

    # ---- CrossEntropy per sample: logsumexp(scores) - scores[label] ----
    max_s = jnp.max(st, axis=0, keepdims=True)                           # (1, TB)
    lse = max_s + jnp.log(jnp.sum(jnp.exp(st - max_s), axis=0, keepdims=True))
    labels = labels_ref[...]                                             # (1, TB)
    picked = jnp.sum(jnp.where(cls == labels, st, 0.0), axis=0, keepdims=True)
    loss_ref[...] = lse - picked                                         # (1, TB)

    # ---- argmax per sample (first-index tie-break, like torch/jnp argmax) ----
    pred_f = jnp.min(jnp.where(st == max_s, cls.astype(jnp.float32), float(cs)),
                     axis=0, keepdims=True)                              # (1, TB)
    pred_ref[...] = pred_f.astype(jnp.int32)


def prepare_padded_params(w1, b1, w2, b2):
    """Pad + cast the MLP parameters ONCE (hoisted out of the per-call path).

    w1: (D, H), b1: (H,), w2: (H, C), b2: (C,)   -- torch weights transposed.
    Returns a params tuple reused by every kernel call.
    """
    D, H = w1.shape
    C = w2.shape[1]
    Hp = _round_up(max(H, LANE), LANE)        # hidden padded to one 128-lane tile
    Cs = _round_up(max(C, 8), 8)              # classes live on sublanes: pad to 8
    w1p = jnp.zeros((D, Hp), jnp.bfloat16).at[:, :H].set(w1.astype(jnp.bfloat16))
    b1p = jnp.zeros((1, Hp), jnp.float32).at[0, :H].set(b1.astype(jnp.float32))
    w2tp = jnp.zeros((Cs, Hp), jnp.bfloat16).at[:C, :H].set(w2.T.astype(jnp.bfloat16))
    b2p = jnp.zeros((Cs, 1), jnp.float32).at[:C, 0].set(b2.astype(jnp.float32))
    return (w1p, b1p, w2tp, b2p, C)


def mlp_loss_and_pred(x, labels, params, *, tb=1024):
    """Batched MLP forward + per-sample CE loss + argmax.

    x: (B, D) float; labels: (B,) int; params from prepare_padded_params().
    Returns (loss: (B,) f32, pred: (B,) int32).

    Pick tb so B % tb == 0 when possible (skips the padding copy of x) and so
    B // tb >= 2 on v7x (both TensorCores get grid steps via the parallel axis).
    """
    w1p, b1p, w2tp, b2p, C = params
    B, D = x.shape
    assert D == w1p.shape[0]
    Hp = w1p.shape[1]
    Cs = w2tp.shape[0]

    tb = min(tb, _round_up(B, 8))
    x = x.astype(jnp.bfloat16)                       # no-op if caller already has bf16
    labels_row = labels.astype(jnp.int32).reshape(1, B)

    if B % tb == 0:
        Bp = B                                       # fast path: no padding copy of x
    else:
        # Ragged tail: pad up to one tile (only hit by the single-sample path here).
        Bp = _round_up(B, tb)
        x = jnp.pad(x, ((0, Bp - B), (0, 0)))
        labels_row = jnp.pad(labels_row, ((0, 0), (0, Bp - B)))

    kernel = functools.partial(mlp_ce_kernel, num_classes=C)

    loss, pred = pl.pallas_call(
        kernel,
        out_shape=(jax.ShapeDtypeStruct((1, Bp), jnp.float32),
                   jax.ShapeDtypeStruct((1, Bp), jnp.int32)),
        grid_spec=pltpu.PrefetchScalarGridSpec(
            num_scalar_prefetch=0,
            grid=(Bp // tb,),
            in_specs=[
                pl.BlockSpec((1, tb), lambda i: (0, i)),     # labels (lane-dense row)
                pl.BlockSpec((tb, D), lambda i: (i, 0)),     # x tile (pipelined stream)
                pl.BlockSpec((D, Hp), lambda i: (0, 0)),     # w1 (VMEM resident)
                pl.BlockSpec((1, Hp), lambda i: (0, 0)),     # b1 (resident)
                pl.BlockSpec((Cs, Hp), lambda i: (0, 0)),    # w2^T (resident)
                pl.BlockSpec((Cs, 1), lambda i: (0, 0)),     # b2 column (resident)
            ],
            out_specs=[
                pl.BlockSpec((1, tb), lambda i: (0, i)),     # loss row (lane-dense)
                pl.BlockSpec((1, tb), lambda i: (0, i)),     # pred row (lane-dense)
            ],
        ),
        compiler_params=pltpu.CompilerParams(
            dimension_semantics=("parallel",)),              # megacore / 2-TC sharding
    )(labels_row, x, w1p, b1p, w2tp, b2p)

    return loss[0, :B], pred[0, :B]


def mlp_module_forward(image, label, params):
    """Equivalent of the torch module's forward((image, label)):
    returns (scalar loss, scalar prediction)."""
    x = image.reshape(1, -1)                     # torch: x.view(1, -1)
    labels = jnp.reshape(label, (1,))
    # Small latency-oriented tile for the single-sample path (pads 1 -> 8 rows).
    loss, pred = mlp_loss_and_pred(x, labels, params, tb=8)
    return loss[0], pred[0]


def _reference(xf, labels, w1, b1, w2, b2):
    """Pure-JAX f32 reference for the same math. Returns (loss, pred, scores)."""
    h = jnp.maximum(xf @ w1 + b1, 0.0)
    s = h @ w2 + b2
    lse = jax.scipy.special.logsumexp(s, axis=-1)
    picked = jnp.take_along_axis(s, labels[:, None], axis=-1)[:, 0]
    return lse - picked, jnp.argmax(s, axis=-1), s


if __name__ == "__main__":
    # Shapes consistent with the module.
    img_size = 16                 # D = 256
    mlp_hidden_dim1 = 32          # H
    num_classes = 2               # C
    D, H, C = img_size * img_size, mlp_hidden_dim1, num_classes

    key = jax.random.PRNGKey(0)
    k_w1, k_b1, k_w2, k_b2, k_x, k_lbl, k_xb, k_lblb = jax.random.split(key, 8)

    # Parameters stored as (in, out) — equivalent to torch's W.T.
    w1 = jax.random.normal(k_w1, (D, H), dtype=jnp.float32) * 0.05
    b1 = jax.random.normal(k_b1, (H,), dtype=jnp.float32) * 0.05
    w2 = jax.random.normal(k_w2, (H, C), dtype=jnp.float32) * 0.05
    b2 = jax.random.normal(k_b2, (C,), dtype=jnp.float32) * 0.05

    params = prepare_padded_params(w1, b1, w2, b2)   # padded/cast once, reused

    # --- Single-sample path: exact semantics of MLP.forward(data_point) ---
    x_img = jax.random.normal(k_x, (img_size, img_size), dtype=jnp.float32)
    label = jax.random.randint(k_lbl, (), 0, C, dtype=jnp.int32)
    loss1, pred1 = mlp_module_forward(x_img, label, params)
    jax.block_until_ready((loss1, pred1))

    ref_l1, ref_p1, ref_s1 = _reference(x_img.reshape(1, -1), label.reshape(1),
                                        w1, b1, w2, b2)
    assert jnp.allclose(loss1, ref_l1[0], atol=2e-2), (loss1, ref_l1[0])
    m1 = jnp.sort(ref_s1, axis=-1)
    margin1 = m1[0, -1] - m1[0, -2]
    assert bool((pred1 == ref_p1[0]) | (margin1 < 2e-2)), (pred1, ref_p1[0])

    # --- Batched path: B % tb == 0 (no padding copy of x); tb=256 keeps the
    #     grid at 2 steps so both v7x TensorCores get work. ---
    B = 512
    x_batch = jax.random.normal(k_xb, (B, img_size, img_size), dtype=jnp.float32)
    labels = jax.random.randint(k_lblb, (B,), 0, C, dtype=jnp.int32)
    xf = x_batch.reshape(B, D)

    loss_b, pred_b = mlp_loss_and_pred(xf, labels, params, tb=256)
    jax.block_until_ready((loss_b, pred_b))

    ref_lb, ref_pb, ref_sb = _reference(xf, labels, w1, b1, w2, b2)
    assert jnp.allclose(loss_b, ref_lb, atol=2e-2), jnp.max(jnp.abs(loss_b - ref_lb))

    # bf16 matmul operands can flip argmax only when the top-2 scores are within
    # bf16 rounding error; tolerate those near-tie samples, require the rest exact.
    ss = jnp.sort(ref_sb, axis=-1)
    margin = ss[:, -1] - ss[:, -2]
    exact = pred_b == ref_pb.astype(jnp.int32)
    assert bool(jnp.all(exact | (margin < 2e-2))), int(jnp.sum(~(exact | (margin < 2e-2))))
    assert float(jnp.mean(exact.astype(jnp.float32))) > 0.95

    print("KERNEL_OK")
</pallas_src>

<mosaic_0001>
module attributes {stable_mosaic.version = 11 : i64} {
  func.func @mlp_ce_kernel(%arg0: i32, %arg1: memref<1x8xi32, #tpu.memory_space<vmem>>, %arg2: memref<8x256xbf16, #tpu.memory_space<vmem>>, %arg3: memref<256x128xbf16, #tpu.memory_space<vmem>>, %arg4: memref<1x128xf32, #tpu.memory_space<vmem>>, %arg5: memref<8x128xbf16, #tpu.memory_space<vmem>>, %arg6: memref<8x1xf32, #tpu.memory_space<vmem>>, %arg7: memref<1x8xf32, #tpu.memory_space<vmem>>, %arg8: memref<1x8xi32, #tpu.memory_space<vmem>>) attributes {dimension_semantics = [#tpu.dimension_semantics<parallel>], iteration_bounds = array<i64: 1>, scalar_prefetch = 0 : i64, scratch_operands = 0 : i64, tpu.core_type = #tpu.core_type<tc>, window_params = [{transform_indices = @transform_0, window_bounds = array<i64: 1, 8>}, {transform_indices = @transform_1, window_bounds = array<i64: 8, 256>}, {pipeline_mode = #tpu.pipeline_mode<synchronous>, transform_indices = @transform_2, window_bounds = array<i64: 256, 128>}, {pipeline_mode = #tpu.pipeline_mode<synchronous>, transform_indices = @transform_3, window_bounds = array<i64: 1, 128>}, {pipeline_mode = #tpu.pipeline_mode<synchronous>, transform_indices = @transform_4, window_bounds = array<i64: 8, 128>}, {pipeline_mode = #tpu.pipeline_mode<synchronous>, transform_indices = @transform_5, window_bounds = array<i64: 8, 1>}, {transform_indices = @transform_6, window_bounds = array<i64: 1, 8>}, {transform_indices = @transform_7, window_bounds = array<i64: 1, 8>}]} {
    %c0 = arith.constant 0 : index
    %c0_0 = arith.constant 0 : index
    %0 = vector.load %arg2[%c0, %c0_0] : memref<8x256xbf16, #tpu.memory_space<vmem>>, vector<8x256xbf16>
    %c0_1 = arith.constant 0 : index
    %c0_2 = arith.constant 0 : index
    %1 = vector.load %arg3[%c0_1, %c0_2] : memref<256x128xbf16, #tpu.memory_space<vmem>>, vector<256x128xbf16>
    %cst = arith.constant dense<0.000000e+00> : vector<8x128xf32>
    %2 = tpu.matmul %0, %1, %cst {dimension_numbers = #tpu.dot_dimension_numbers<[1], [0], [0], [1], [0, 0, 1, 1], [], []>} : vector<8x256xbf16>, vector<256x128xbf16>, vector<8x128xf32> -> vector<8x128xf32>
    %c0_3 = arith.constant 0 : index
    %c0_4 = arith.constant 0 : index
    %3 = vector.load %arg4[%c0_3, %c0_4] : memref<1x128xf32, #tpu.memory_space<vmem>>, vector<1x128xf32>
    %4 = vector.broadcast %3 : vector<1x128xf32> to vector<8x128xf32>
    %5 = arith.addf %2, %4 : vector<8x128xf32>
    %cst_5 = arith.constant 0.000000e+00 : f32
    %6 = vector.broadcast %cst_5 : f32 to vector<8x128xf32>
    %7 = arith.maximumf %5, %6 : vector<8x128xf32>
    %8 = arith.truncf %7 : vector<8x128xf32> to vector<8x128xbf16>
    %c0_6 = arith.constant 0 : index
    %c0_7 = arith.constant 0 : index
    %9 = vector.load %arg5[%c0_6, %c0_7] : memref<8x128xbf16, #tpu.memory_space<vmem>>, vector<8x128xbf16>
    %cst_8 = arith.constant dense<0.000000e+00> : vector<8x8xf32>
    %10 = tpu.matmul %9, %8, %cst_8 {dimension_numbers = #tpu.dot_dimension_numbers<[1], [1], [0], [0], [0, 0, 1, 0], [], []>} : vector<8x128xbf16>, vector<8x128xbf16>, vector<8x8xf32> -> vector<8x8xf32>
    %c0_9 = arith.constant 0 : index
    %c0_10 = arith.constant 0 : index
    %11 = vector.load %arg6[%c0_9, %c0_10] : memref<8x1xf32, #tpu.memory_space<vmem>>, vector<8x1xf32>
    %12 = vector.broadcast %11 : vector<8x1xf32> to vector<8x8xf32>
    %13 = arith.addf %10, %12 : vector<8x8xf32>
    %14 = tpu.iota {dimensions = array<i32: 0>} : vector<8x8xi32>
    %c2_i32 = arith.constant 2 : i32
    %15 = vector.broadcast %c2_i32 : i32 to vector<8x8xi32>
    %16 = arith.cmpi slt, %14, %15 : vector<8x8xi32>
    %cst_11 = arith.constant -1.000000e+30 : f32
    %17 = vector.broadcast %cst_11 : f32 to vector<8x8xf32>
    %18 = arith.select %16, %13, %17 : vector<8x8xi1>, vector<8x8xf32>
    %cst_12 = arith.constant dense<0xFF800000> : vector<8xf32>
    %19 = vector.multi_reduction <maximumf>, %18, %cst_12 [0] : vector<8x8xf32> to vector<8xf32>
    %20 = vector.shape_cast %19 : vector<8xf32> to vector<1x8xf32>
    %21 = vector.broadcast %20 : vector<1x8xf32> to vector<8x8xf32>
    %22 = arith.subf %18, %21 : vector<8x8xf32>
    %23 = math.exp %22 : vector<8x8xf32>
    %cst_13 = arith.constant dense<0.000000e+00> : vector<8xf32>
    %24 = vector.multi_reduction <add>, %23, %cst_13 [0] : vector<8x8xf32> to vector<8xf32>
    %25 = vector.shape_cast %24 : vector<8xf32> to vector<1x8xf32>
    %26 = math.log %25 : vector<1x8xf32>
    %27 = arith.addf %20, %26 : vector<1x8xf32>
    %c0_14 = arith.constant 0 : index
    %c0_15 = arith.constant 0 : index
    %28 = vector.load %arg1[%c0_14, %c0_15] : memref<1x8xi32, #tpu.memory_space<vmem>>, vector<1x8xi32>
    %29 = vector.broadcast %28 : vector<1x8xi32> to vector<8x8xi32>
    %30 = arith.cmpi eq, %14, %29 : vector<8x8xi32>
    %cst_16 = arith.constant 0.000000e+00 : f32
    %31 = vector.broadcast %cst_16 : f32 to vector<8x8xf32>
    %32 = arith.select %30, %18, %31 : vector<8x8xi1>, vector<8x8xf32>
    %cst_17 = arith.constant dense<0.000000e+00> : vector<8xf32>
    %33 = vector.multi_reduction <add>, %32, %cst_17 [0] : vector<8x8xf32> to vector<8xf32>
    %34 = vector.shape_cast %33 : vector<8xf32> to vector<1x8xf32>
    %35 = arith.subf %27, %34 : vector<1x8xf32>
    %c0_18 = arith.constant 0 : index
    %c0_19 = arith.constant 0 : index
    %36 = vector.load %arg7[%c0_18, %c0_19] : memref<1x8xf32, #tpu.memory_space<vmem>>, vector<1x8xf32>
    tpu.vector_store %arg7[%c0_18, %c0_19], %35 {strides = array<i32>} : memref<1x8xf32, #tpu.memory_space<vmem>>, vector<1x8xf32>,
    %37 = vector.broadcast %20 : vector<1x8xf32> to vector<8x8xf32>
    %38 = arith.cmpf oeq, %18, %37 : vector<8x8xf32>
    %39 = arith.sitofp %14 : vector<8x8xi32> to vector<8x8xf32>
    %cst_20 = arith.constant 8.000000e+00 : f32
    %40 = vector.broadcast %cst_20 : f32 to vector<8x8xf32>
    %41 = arith.select %38, %39, %40 : vector<8x8xi1>, vector<8x8xf32>
    %cst_21 = arith.constant dense<0x7F800000> : vector<8xf32>
    %42 = vector.multi_reduction <minimumf>, %41, %cst_21 [0] : vector<8x8xf32> to vector<8xf32>
    %43 = vector.shape_cast %42 : vector<8xf32> to vector<1x8xf32>
    %44 = arith.fptosi %43 : vector<1x8xf32> to vector<1x8xi32>
    %c0_22 = arith.constant 0 : index
    %c0_23 = arith.constant 0 : index
    %45 = vector.load %arg8[%c0_22, %c0_23] : memref<1x8xi32, #tpu.memory_space<vmem>>, vector<1x8xi32>
    tpu.vector_store %arg8[%c0_22, %c0_23], %44 {strides = array<i32>} : memref<1x8xi32, #tpu.memory_space<vmem>>, vector<1x8xi32>,
    return
  }
  func.func @transform_0(%arg0: i32) -> (i32, i32) {
    %c0_i32 = arith.constant 0 : i32
    %c0_i32_0 = arith.constant 0 : i32
    return %c0_i32, %arg0 : i32, i32
  }
  func.func @transform_1(%arg0: i32) -> (i32, i32) {
    %c0_i32 = arith.constant 0 : i32
    %c0_i32_0 = arith.constant 0 : i32
    return %arg0, %c0_i32 : i32, i32
  }
  func.func @transform_2(%arg0: i32) -> (i32, i32) {
    %c0_i32 = arith.constant 0 : i32
    %c0_i32_0 = arith.constant 0 : i32
    %c0_i32_1 = arith.constant 0 : i32
    return %c0_i32, %c0_i32_0 : i32, i32
  }
  func.func @transform_3(%arg0: i32) -> (i32, i32) {
    %c0_i32 = arith.constant 0 : i32
    %c0_i32_0 = arith.constant 0 : i32
    %c0_i32_1 = arith.constant 0 : i32
    return %c0_i32, %c0_i32_0 : i32, i32
  }
  func.func @transform_4(%arg0: i32) -> (i32, i32) {
    %c0_i32 = arith.constant 0 : i32
    %c0_i32_0 = arith.constant 0 : i32
    %c0_i32_1 = arith.constant 0 : i32
    return %c0_i32, %c0_i32_0 : i32, i32
  }
  func.func @transform_5(%arg0: i32) -> (i32, i32) {
    %c0_i32 = arith.constant 0 : i32
    %c0_i32_0 = arith.constant 0 : i32
    %c0_i32_1 = arith.constant 0 : i32
    return %c0_i32, %c0_i32_0 : i32, i32
  }
  func.func @transform_6(%arg0: i32) -> (i32, i32) {
    %c0_i32 = arith.constant 0 : i32
    %c0_i32_0 = arith.constant 0 : i32
    return %c0_i32, %arg0 : i32, i32
  }
  func.func @transform_7(%arg0: i32) -> (i32, i32) {
    %c0_i32 = arith.constant 0 : i32
    %c0_i32_0 = arith.constant 0 : i32
    return %c0_i32, %arg0 : i32, i32
  }
}

</mosaic_0001>

<bundles_post_ra>
// kernel: tpu_custom_call.1
= control target key start
LH: loop header
LB: loop body
LE: loop exit
PB: predicated region body
PF: predicated region fallthrough
CT: control target
= control target key end

     0   :  { %13 = vsyncpa [#allocation3], 0  ;;  %s672_s0 = inlined_call_operand.hbm [shape: s32[1,8], index: 0, kind: input, shape index: {}]   ;;  %s673_s1 = inlined_call_operand.vmem [shape: bf16[8,256], index: 1, kind: input, shape index: {}]   ;;  %s674_s2 = inlined_call_operand.hbm [shape: bf16[256,128], index: 2, kind: input, shape index: {}]   ;;  %s675_s3 = inlined_call_operand.vmem [shape: f32[1,128], index: 3, kind: input, shape index: {}]   ;;  %s676_s4 = inlined_call_operand.vmem [shape: bf16[8,128], index: 4, kind: input, shape index: {}]   ;;  %s677_s5 = inlined_call_operand.vmem [shape: f32[8,1], index: 5, kind: input, shape index: {}]   ;;  %s678_s6 = inlined_call_operand.hbm [shape: f32[1,8], index: 6, kind: output, shape index: {0}]   ;;  %s679_s7 = inlined_call_operand.hbm [shape: s32[1,8], index: 7, kind: output, shape index: {1}]  }
   0x1   :  { %14 = vsyncpa [#allocation6], 0 }
   0x2   :  { %15 = vsyncpa [#allocation4], 0 }
   0x3   :  { %16 = vsyncpa [#allocation9], 0  ;;  %s550_s24 = smov [#allocation2]   ;;  %s551_s26 = smov [#allocation5]  }
   0x4   :  { %s23_s25 = sshll.u32 %s550_s24, 4  ;;  %s34_s27 = sshll.u32 %s551_s26, 4  ;;  %s24_s25 = int_to_ptr.vmem [resolvable:$true] %s23_s25  ;;  %s599_s27 = int_to_ptr.vmem [resolvable:$true] %s34_s27 }
   0x5   :  { %s454_s30 = scalar_lea.hbm %s672_s0, 16 }
   0x6   :  { %p455_p0 = scmp.ne.s32.totalorder %s672_s0, %s454_s30  ;;  %p458_p1 = scmp.lt.u32.totalorder %s454_s30, %s672_s0 }
   0x8   :  { %p460_p2 = pnand %p458_p1, %p455_p0 }
   0xa   :  { %463 = shalt.err (!%p460_p2)
}
   0xb   :  { %s464_s12 = scalar_lea.vmem %s24_s25, 16  ;;  %s468_s13 = scalar_lea.vmem %s24_s25, 32 }
   0xc   :  { %p465_p3 = scmp.ne.s32.totalorder %s24_s25, %s464_s12  ;;  %p469_p4 = scmp.lt.s32.totalorder %s24_s25, %s24_s25 }
   0xd   :  { %p470_p5 = scmp.lt.s32.totalorder %s468_s13, %s464_s12 }
   0xf   :  { %p471_p6 = por %p470_p5, %p469_p4 }
  0x11   :  { %p472_p7 = pnand %p471_p6, %p465_p3 }
  0x13   :  { %475 = shalt.err (!%p472_p7)
}
  0x14   :  { %26 = dma.hbm_to_vmem [thread:$0]  %s672_s0, 16, %s24_s25, [#allocation3]  }
  0x15   :  { %s476_s18 = scalar_lea.hbm %s674_s2, 2048 }
  0x16   :  { %p477_p8 = scmp.ne.s32.totalorder %s674_s2, %s476_s18  ;;  %p480_p9 = scmp.lt.u32.totalorder %s476_s18, %s674_s2 }
  0x18   :  { %p482_p10 = pnand %p480_p9, %p477_p8 }
  0x1a   :  { %485 = shalt.err (!%p482_p10)
}
  0x1b   :  { %s486_s23 = scalar_lea.vmem %s599_s27, 2048  ;;  %p491_p12 = scmp.lt.s32.totalorder %s599_s27, %s599_s27 }
  0x1c   :  { %p487_p11 = scmp.ne.s32.totalorder %s599_s27, %s486_s23  ;;  %p492_p13 = scmp.lt.s32.totalorder %s486_s23, %s486_s23 }
  0x1e   :  { %p493_p0 = por %p492_p13, %p491_p12 }
  0x20   :  { %p494_p1 = pnand %p493_p0, %p487_p11 }
  0x22   :  { %497 = shalt.err (!%p494_p1)
}
  0x23   :  { %s552_s0 = smov 64   ;;  %s553_s24 = smov 4  }
  0x24   :  { %40 = dma.hbm_to_vmem [thread:$0]  %s674_s2, 2048, %s599_s27, [#allocation6], %s552_s0, %s552_s0, %s553_s24  }
  0x25   :  { %542 = dma.done.wait [#allocation3], 16  }
  0x26   :  { %543 = vsyncadd [#allocation3], 4294967280 }
  0x27   :  { %544 = dma.done.wait [#allocation6], 2048  }
  0x28   :  { %545 = vsyncadd [#allocation6], 4294965248  ;;  %v432_v0 = vld [vmem:[#allocation5 + $0x40] sm:$0xff]   ;;  %v434_v2 = vld [vmem:[#allocation5 + $0x48] sm:$0xff]   ;;  %v554_v19 = vmov 0.0   ;;  %vm555_vm0 = vmmov 0   ;;  %v286_v32 = vlaneseq }
  0x29   :  { %v433_v1 = vld [vmem:[#allocation5] sm:$0xff]   ;;  %390 = vmatprep.subr.bf16.mxu0 %v432_v0  ;;  %v435_v3 = vld [vmem:[#allocation5 + $0x8] sm:$0xff]   ;;  %v436_v4 = vld [vmem:[#allocation5 + $0x50] sm:$0xff]   ;;  %414 = vmatprep.subr.bf16.mxu1 %v554_v19  ;;  %v556_v21 = vmov 0   ;;  %vm290_vm2 = vcmask 64512   ;;  %vm326_vm5 = vcmask 57344  }
  0x2a   :  { %391 = vmatpush3.bf16.msra.mxu0 %v433_v1  ;;  %v437_v5 = vld [vmem:[#allocation5 + $0x10] sm:$0xff]   ;;  %v438_v6 = vld [vmem:[#allocation5 + $0x58] sm:$0xff]   ;;  %v440_v8 = vld [vmem:[#allocation5 + $0x60] sm:$0xff]   ;;  %416 = vmatprep.mubr.msk.bf16.mxu1 %vm555_vm0, %v554_v19  ;;  %v287_v33 = vshrl.u32 %v286_v32, 7 }
  0x2b   :  { %392 = vmatprep.subr.bf16.mxu0 %v434_v2  ;;  %v439_v7 = vld [vmem:[#allocation5 + $0x18] sm:$0xff]   ;;  %v441_v9 = vld [vmem:[#allocation5 + $0x20] sm:$0xff]   ;;  %v442_v10 = vld [vmem:[#allocation5 + $0x68] sm:$0xff]   ;;  %431 = vset.pattern.permute.xlu0 %v556_v21 }
  0x2c   :  { %v54_v11 = vld [vmem:[%s673_s1] sm:$0xff]  ;;  %v443_v13 = vld [vmem:[#allocation5 + $0x28] sm:$0xff]   ;;  %v444_v14 = vld [vmem:[#allocation5 + $0x70] sm:$0xff]   ;;  %vm288_vm1 = vcmp.lt.s32.totalorder %v287_v33, 2  ;;  %v329_v47 = vcvt.s32.f32 %v287_v33 }
  0x2d   :  { %v372_v12 = vcombine.high %v54_v11, %v54_v11  ;;  %v445_v15 = vld [vmem:[#allocation5 + $0x30] sm:$0xff]   ;;  %v446_v16 = vld [vmem:[#allocation5 + $0x78] sm:$0xff]   ;;  %v371_v18 = vcombine.low %v54_v11, %v54_v11 }
  0x2e   :  { %393 = vmatpush3.bf16.msra.mxu0 %v435_v3  ;;  %v447_v17 = vld [vmem:[#allocation5 + $0x38] sm:$0xff]  }
  0x2f   :  { %394 = vmatprep.subr.bf16.mxu0 %v436_v4  ;;  %229 = vmatprep.mubr.bf16.mxu0 %v372_v12  ;;  %v240_v20 = vld [vmem:[%s677_s5] sm:$0xff] }
  0x30   :  { %243 = vperm.xlu0 %431, %v240_v20   ;;  %v370_v24 = vld [vmem:[%s675_s3] ss:$0 sm:$0xff]  ;;  %s557_s3 = smov [#allocation8]  }
  0x31   :  { %v239_v31 = vld [vmem:[%s676_s4] sm:$0xf]  ;;  %s356_s4 = sshll.u32 %s557_s3, 4  ;;  %s357_s4 = int_to_ptr.vmem [resolvable:$true] %s356_s4 }
  0x32   :  { %395 = vmatpush3.bf16.msra.mxu0 %v437_v5  ;;  %v389_v56 = vld [vmem:[#allocation2] ss:$0 sm:$0xff]  ;;  %s498_s5 = scalar_lea.vmem %s357_s4, 16  ;;  %s502_s10 = scalar_lea.vmem %s357_s4, 32 }
  0x33   :  { %396 = vmatprep.subr.bf16.mxu0 %v438_v6  ;;  %vm316_vm4 = vcmp.eq.s32.totalorder %v287_v33, %v389_v56  ;;  %p499_p2 = scmp.ne.s32.totalorder %s357_s4, %s498_s5  ;;  %p503_p3 = scmp.lt.s32.totalorder %s357_s4, %s357_s4 }
  0x34   :  { %p504_p4 = scmp.lt.s32.totalorder %s502_s10, %s498_s5 }
  0x36   :  { %397 = vmatpush3.bf16.msra.mxu0 %v439_v7  ;;  %p505_p5 = por %p504_p4, %p503_p3 }
  0x37   :  { %398 = vmatprep.subr.bf16.mxu0 %v440_v8 }
  0x38   :  { %p506_p6 = pnand %p505_p5, %p499_p2 }
  0x3a   :  { %399 = vmatpush3.bf16.msra.mxu0 %v441_v9 }
  0x3b   :  { %400 = vmatprep.subr.bf16.mxu0 %v442_v10 }
  0x3e   :  { %401 = vmatpush3.bf16.msra.mxu0 %v443_v13 }
  0x3f   :  { %402 = vmatprep.subr.bf16.mxu0 %v444_v14 }
  0x42   :  { %403 = vmatpush3.bf16.msra.mxu0 %v445_v15 }
  0x43   :  { %404 = vmatprep.subr.bf16.mxu0 %v446_v16 }
  0x46   :  { %405 = vmatpush3.bf16.msra.mxu0 %v447_v17 }
  0x49   :  { %230 = vmatmul.mubr.bf16.vlgmr.msra.gmra.mrb[0].mxu0 %v371_v18 }
  0xaf   :  { %v244_v34 = vpop.permute.xlu0 %243 }
 0x11c   :  { %v406_v22 = vpop.f32.mrb[0].mxu0 }
 0x11d   :  { %v407_v23 = vpop.f32.mrb[1].mxu0 }
 0x11e   :  { %v408_v25 = vadd.f32 %v407_v23, %v406_v22  ;;  %v409_v26 = vpop.f32.mrb[2].mxu0 }
 0x11f   :  { %v410_v27 = vpop.f32.mrb[3].mxu0 }
 0x120   :  { %v232_v28 = vadd.f32 %v408_v25, %v370_v24 }
 0x122   :  { %v237_v29 = vmax.f32 %v232_v28, 0.0 }
 0x124   :  { %v238_v30 = vpack.c.bf16 %v237_v29, %v237_v29 }
 0x126   :  { %415 = vmatpush3.bf16.xpose.msra.mxu1 %v238_v30 }
 0x12d   :  { %417 = vmatmul.mubr.bf16.vlgmr.msra.gmra.mrb[0].mxu1 %v239_v31 }
 0x200   :  { %v280_v35 = vpop.f32.mrb[0].mxu1 }
 0x201   :  { %v281_v36 = vadd.f32 %v280_v35, %v244_v34  ;;  %v418_v37 = vpop.f32.mrb[1].mxu1 }
 0x202   :  { %v283_v38 = vpop.f32.mrb[2].mxu1 }
 0x203   :  { %v289_v39 = vsel %vm288_vm1, %v281_v36, -1e+30  ;;  %v419_v40 = vpop.f32.mrb[3].mxu1 }
 0x204   :  { %v291_v41 = vsel %vm290_vm2, %v289_v39, -inf  ;;  %v317_v62 = vsel %vm316_vm4, %v289_v39, 0.0 }
 0x205   :  { %v292_v42 = vrot.slane %v291_v41, 4  ;;  %v318_v3 = vsel %vm290_vm2, %v317_v62, 0.0 }
 0x207   :  { %v293_v43 = vmax.f32 %v291_v41, %v292_v42 }
 0x209   :  { %v294_v44 = vrot.slane %v293_v43, 2 }
 0x20b   :  { %v295_v45 = vmax.f32 %v293_v43, %v294_v44 }
 0x20d   :  { %v296_v46 = vrot.slane %v295_v45, 1 }
 0x20f   :  { %v297_v48 = vmax.f32 %v295_v45, %v296_v46 }
 0x211   :  { %v298_v49 = vsub.f32 %v289_v39, %v297_v48  ;;  %vm328_vm3 = vcmp.eq.f32.partialorder %v289_v39, %v297_v48 }
 0x212   :  { %v330_v50 = vsel %vm328_vm3, %v329_v47, 8.0 }
 0x213   :  { %v299_v51 = vmul.f32 1.442695, %v298_v49  ;;  %v331_v52 = vsel %vm290_vm2, %v330_v50, inf }
 0x214   :  { %v332_v53 = vrot.slane %v331_v52, 4 }
 0x215   :  { %450 = vpow2.f32 %v299_v51 }
 0x216   :  { %v333_v54 = vmin.f32 %v331_v52, %v332_v53 }
 0x218   :  { %v334_v55 = vrot.slane %v333_v54, 2 }
 0x21a   :  { %v335_v57 = vmin.f32 %v333_v54, %v334_v55 }
 0x21c   :  { %v336_v58 = vrot.slane %v335_v57, 1 }
 0x21e   :  { %v337_v59 = vmin.f32 %v335_v57, %v336_v58 }
 0x21f   :  { %v451_v60 = vpop.eup %450 }
 0x220   :  { %v301_v61 = vsel %vm290_vm2, %v451_v60, 0.0  ;;  %v420_v63 = vtrunc.f32 %v337_v59 }
 0x221   :  { %v302_v0 = vrot.slane %v301_v61, 4 }
 0x222   :  { %v421_v1 = vcvt.f32.s32 %v420_v63 }
 0x223   :  { %v303_v2 = vadd.f32 %v302_v0, %v301_v61 }
 0x224   :  { %339 = vst.msk [vmem:[#allocation8] sm:$0x1] %vm326_vm5, %v421_v1 }
 0x225   :  { %v304_v4 = vrot.slane %v303_v2, 2 }
 0x226   :  { %509 = shalt.err (!%p506_p6)
}
 0x227   :  { %s510_s13 = scalar_lea.hbm %s679_s7, 16 }
 0x228   :  { %p511_p7 = scmp.ne.s32.totalorder %s679_s7, %s510_s13  ;;  %p514_p8 = scmp.lt.u32.totalorder %s510_s13, %s679_s7 }
 0x22a   :  { %p516_p9 = pnand %p514_p8, %p511_p7 }
 0x22c   :  { %519 = shalt.err (!%p516_p9)
}
 0x22d   :  { %359 = dma.vmem_to_hbm [thread:$0]  %s357_s4, 16, %s679_s7, [#allocation9]   ;;  %v319_v5 = vrot.slane %v318_v3, 4  ;;  %v305_v6 = vadd.f32 %v304_v4, %v303_v2 }
 0x22e   :  { %s558_s20 = smov [#allocation7]  }
 0x22f   :  { %v306_v7 = vrot.slane %v305_v6, 1  ;;  %v320_v8 = vadd.f32 %v319_v5, %v318_v3  ;;  %s346_s21 = sshll.u32 %s558_s20, 4  ;;  %s347_s21 = int_to_ptr.vmem [resolvable:$true] %s346_s21 }
 0x230   :  { %s520_s7 = scalar_lea.vmem %s347_s21, 16  ;;  %s524_s22 = scalar_lea.vmem %s347_s21, 32 }
 0x231   :  { %v307_v9 = vadd.f32 %v306_v7, %v305_v6  ;;  %v321_v10 = vrot.slane %v320_v8, 2  ;;  %p521_p10 = scmp.ne.s32.totalorder %s347_s21, %s520_s7  ;;  %p525_p11 = scmp.lt.s32.totalorder %s347_s21, %s347_s21 }
 0x232   :  { %p526_p12 = scmp.lt.s32.totalorder %s524_s22, %s520_s7 }
 0x233   :  { %452 = vlog2.f32 %v307_v9  ;;  %v322_v11 = vadd.f32 %v321_v10, %v320_v8 }
 0x234   :  { %p527_p13 = por %p526_p12, %p525_p11 }
 0x235   :  { %v323_v12 = vrot.slane %v322_v11, 1 }
 0x236   :  { %p528_p0 = pnand %p527_p13, %p521_p10 }
 0x237   :  { %v324_v16 = vadd.f32 %v323_v12, %v322_v11 }
 0x23d   :  { %v453_v13 = vpop.eup %452 }
 0x23e   :  { %v309_v14 = vmul.f32 0.6931472, %v453_v13 }
 0x240   :  { %v310_v15 = vadd.f32 %v309_v14, %v297_v48 }
 0x242   :  { %v325_v17 = vsub.f32 %v310_v15, %v324_v16 }
 0x244   :  { %327 = vst.msk [vmem:[#allocation7] sm:$0x1] %vm326_vm5, %v325_v17 }
 0x245   :  { %531 = shalt.err (!%p528_p0)
}
 0x246   :  { %s532_s24 = scalar_lea.hbm %s678_s6, 16 }
 0x247   :  { %p533_p1 = scmp.ne.s32.totalorder %s678_s6, %s532_s24  ;;  %p536_p2 = scmp.lt.u32.totalorder %s532_s24, %s678_s6 }
 0x249   :  { %p538_p3 = pnand %p536_p2, %p533_p1 }
 0x24b   :  { %541 = shalt.err (!%p538_p3)
}
 0x24c   :  { %349 = dma.vmem_to_hbm [thread:$0]  %s347_s21, 16, %s678_s6, [#allocation4]  }
 0x24d   :  { %546 = dma.done.wait [#allocation4], 16  }
 0x24e   :  { %547 = vsyncadd [#allocation4], 4294967280 }
 0x24f   :  { %548 = dma.done.wait [#allocation9], 16  }
 0x250   :  { %549 = vsyncadd [#allocation9], 4294967280 }
 0x251   :  { %366 = vsyncpa [#allocation3], 1 }
 0x252   :  { %367 = vsyncpa [#allocation6], 1 }
 0x253   :  { %368 = vsyncpa [#allocation4], 1 }
 0x254   :  { %369 = vsyncpa [#allocation9], 1 }

</bundles_post_ra>
